<compile_context>
chip_gen: v6e
topology: v6e:2x2x1
jax: 0.10.0
libtpu: 0.0.40
codegen_flags: <defaults>
</compile_context>

<pallas_src>
import functools

import jax
import jax.numpy as jnp
import numpy as np
from jax.experimental import pallas as pl
from jax.experimental.pallas import tpu as pltpu


def _prompt_kernel(xy_ref, rc_ref, prog_ref, norm_ref, x_ref, o_ref, *,
                   mask_size):
    """One batch block per grid step, fully lane-dense flat layout.

    xy_ref   : SMEM int32 (2,)          -- scalar-prefetched mask origin (x_, y_)
    rc_ref   : VMEM int32 (2, 3*O*O)    -- row (H) / col (W) index of each pixel
    prog_ref : VMEM f32  (1, 3*O*O)     -- learnable program, flattened
    norm_ref : VMEM f32  (2, 3*O*O)     -- [scale; bias] per pixel (per channel)
    x_ref    : VMEM f32  (bt, 3*O*O)    -- zero-padded input block, flattened
    o_ref    : VMEM f32  (bt, 3*O*O)
    """
    x0 = xy_ref[0]
    y0 = xy_ref[1]

    rows = rc_ref[0:1, :]                       # (1, 3*O*O)
    cols = rc_ref[1:2, :]                       # (1, 3*O*O)
    inside = ((rows >= x0) & (rows < x0 + mask_size) &
              (cols >= y0) & (cols < y0 + mask_size))

    # Per-call-constant prompt: computed once per grid step, amortized over the
    # whole (bt, 3*O*O) batch block.
    prompt = jnp.where(inside, jax.nn.sigmoid(prog_ref[...]), 0.0)   # (1, 3*O*O)

    v = x_ref[...] + prompt                     # broadcast over the batch block
    v = jnp.clip(v, 0.0, 1.0)
    # normalize: (v - mean) / std  ==  v * scale + bias  (fused multiply-add)
    v = v * norm_ref[0:1, :] + norm_ref[1:2, :]
    o_ref[...] = v.astype(o_ref.dtype)


def _pick_batch_block(batch, flat_len, vmem_budget_bytes=24 << 20):
    """Largest batch block whose double-buffered in+out footprint fits budget."""
    per_sample = flat_len * 4 * 2 * 2           # f32, in + out, double-buffered
    cap = max(1, vmem_budget_bytes // per_sample)
    bt = int(min(batch, cap, 16))
    if bt >= batch:
        return batch                            # whole batch in one grid step
    # Block second-minor dim must be a multiple of 8 (or equal the full dim).
    bt = max(8, (bt // 8) * 8)
    while bt > 8 and batch % bt:
        bt -= 8
    if batch % bt:
        return batch                            # fallback: single block
    return bt


def random_visual_prompt(x, program, mean, std, xy, *,
                         output_size, mask_size, l_pad, r_pad):
    """JAX wrapper reproducing RandomVisualPrompt.forward (NCHW)."""
    batch, chans = x.shape[0], x.shape[1]
    o = output_size
    flat = chans * o * o

    # F.pad(x, (l_pad, r_pad, l_pad, r_pad), value=0), then flatten each image
    # into a lane-dense row (reshape of the contiguous padded array is free).
    x_flat = jnp.pad(
        x, ((0, 0), (0, 0), (l_pad, r_pad), (l_pad, r_pad))
    ).reshape(batch, flat).astype(jnp.float32)

    prog_flat = program.reshape(1, flat).astype(jnp.float32)

    # Row / col index of every flattened pixel (channel-major layout).
    pix = jnp.arange(o * o, dtype=jnp.int32)
    rows = jnp.tile(pix // o, chans)
    cols = jnp.tile(pix % o, chans)
    rc = jnp.stack([rows, cols]).astype(jnp.int32)            # (2, flat)

    inv_std = (1.0 / std).astype(jnp.float32)
    scale = jnp.repeat(inv_std, o * o)
    bias = jnp.repeat(-mean.astype(jnp.float32) * inv_std, o * o)
    norm = jnp.stack([scale, bias]).astype(jnp.float32)       # (2, flat)

    xy = xy.astype(jnp.int32)

    bt = _pick_batch_block(batch, flat)
    grid = (batch // bt,)

    kernel = functools.partial(_prompt_kernel, mask_size=mask_size)

    out_flat = pl.pallas_call(
        kernel,
        out_shape=jax.ShapeDtypeStruct((batch, flat), jnp.float32),
        grid_spec=pltpu.PrefetchScalarGridSpec(
            num_scalar_prefetch=1,              # xy -> SMEM
            grid=grid,
            in_specs=[
                pl.BlockSpec((2, flat), lambda b, xy: (0, 0)),   # row/col ids
                pl.BlockSpec((1, flat), lambda b, xy: (0, 0)),   # program
                pl.BlockSpec((2, flat), lambda b, xy: (0, 0)),   # scale/bias
                pl.BlockSpec((bt, flat), lambda b, xy: (b, 0)),  # x (padded)
            ],
            out_specs=pl.BlockSpec((bt, flat), lambda b, xy: (b, 0)),
        ),
        compiler_params=pltpu.CompilerParams(
            dimension_semantics=("parallel",),
            vmem_limit_bytes=64 * 1024 * 1024,
        ),
    )(xy, rc, prog_flat, norm, x_flat)

    return out_flat.reshape(batch, chans, o, o)


def _reference(x, program, mean, std, xy, *, output_size, mask_size,
               l_pad, r_pad):
    """Pure-JAX reference mirroring the PyTorch forward."""
    x_pad = jnp.pad(x, ((0, 0), (0, 0), (l_pad, r_pad), (l_pad, r_pad)))
    rows = jnp.arange(output_size)[:, None]
    cols = jnp.arange(output_size)[None, :]
    mask = (((rows >= xy[0]) & (rows < xy[0] + mask_size) &
             (cols >= xy[1]) & (cols < xy[1] + mask_size))
            .astype(jnp.float32))[None, :, :]
    v = x_pad + jax.nn.sigmoid(program)[None] * mask[None]
    v = jnp.clip(v, 0.0, 1.0)
    v = (v - mean.reshape(1, 3, 1, 1)) * (1.0 / std).reshape(1, 3, 1, 1)
    return v


if __name__ == "__main__":
    # Small synthetic config consistent with the module.
    input_size = 12
    output_size = 16
    mask_size = 6
    l_pad = int((output_size - input_size + 1) / 2)
    r_pad = int((output_size - input_size) / 2)
    batch = 4

    key = jax.random.PRNGKey(0)
    k_x, k_xy = jax.random.split(key, 2)

    # Input image batch in [0, 1], NCHW.
    x = jax.random.uniform(k_x, (batch, 3, input_size, input_size),
                           dtype=jnp.float32)

    # nn.Parameter init in the module is zeros(3, O, O).
    program = jnp.zeros((3, output_size, output_size), jnp.float32)

    # Deterministic stand-in for the external `normalize` (per-channel mean/std).
    mean = jnp.array([0.485, 0.456, 0.406], jnp.float32)
    std = jnp.array([0.229, 0.224, 0.225], jnp.float32)

    # Deterministic stand-in for np.random.choice(output_size - mask_size).
    xy = jax.random.randint(k_xy, (2,), 0, output_size - mask_size,
                            dtype=jnp.int32)

    out = random_visual_prompt(x, program, mean, std, xy,
                               output_size=output_size, mask_size=mask_size,
                               l_pad=l_pad, r_pad=r_pad)
    jax.block_until_ready(out)

    ref = _reference(x, program, mean, std, xy,
                     output_size=output_size, mask_size=mask_size,
                     l_pad=l_pad, r_pad=r_pad)
    np.testing.assert_allclose(np.asarray(out), np.asarray(ref),
                               rtol=1e-5, atol=1e-5)

    print("KERNEL_OK")
</pallas_src>

<mosaic_0001>
module attributes {stable_mosaic.version = 11 : i64} {
  func.func @_prompt_kernel(%arg0: i32, %arg1: memref<2xi32, #tpu.memory_space<smem>>, %arg2: memref<2x768xi32, #tpu.memory_space<vmem>>, %arg3: memref<1x768xf32, #tpu.memory_space<vmem>>, %arg4: memref<2x768xf32, #tpu.memory_space<vmem>>, %arg5: memref<4x768xf32, #tpu.memory_space<vmem>>, %arg6: memref<4x768xf32, #tpu.memory_space<vmem>>) attributes {dimension_semantics = [#tpu.dimension_semantics<parallel>], iteration_bounds = array<i64: 1>, scalar_prefetch = 1 : i64, scratch_operands = 0 : i64, tpu.core_type = #tpu.core_type<tc>, window_params = [{pipeline_mode = #tpu.pipeline_mode<synchronous>, transform_indices = @transform_0, window_bounds = array<i64: 2, 768>}, {pipeline_mode = #tpu.pipeline_mode<synchronous>, transform_indices = @transform_1, window_bounds = array<i64: 1, 768>}, {pipeline_mode = #tpu.pipeline_mode<synchronous>, transform_indices = @transform_2, window_bounds = array<i64: 2, 768>}, {transform_indices = @transform_3, window_bounds = array<i64: 4, 768>}, {transform_indices = @transform_4, window_bounds = array<i64: 4, 768>}]} {
    %c0 = arith.constant 0 : index
    %0 = memref.load %arg1[%c0] : memref<2xi32, #tpu.memory_space<smem>>
    %c1 = arith.constant 1 : index
    %1 = memref.load %arg1[%c1] : memref<2xi32, #tpu.memory_space<smem>>
    %c0_0 = arith.constant 0 : index
    %c0_1 = arith.constant 0 : index
    %2 = vector.load %arg2[%c0_0, %c0_1] : memref<2x768xi32, #tpu.memory_space<vmem>>, vector<1x768xi32>
    %c1_2 = arith.constant 1 : index
    %c0_3 = arith.constant 0 : index
    %3 = vector.load %arg2[%c1_2, %c0_3] : memref<2x768xi32, #tpu.memory_space<vmem>>, vector<1x768xi32>
    %4 = vector.broadcast %0 : i32 to vector<1x768xi32>
    %5 = arith.cmpi sge, %2, %4 : vector<1x768xi32>
    %c6_i32 = arith.constant 6 : i32
    %6 = arith.addi %0, %c6_i32 : i32
    %7 = vector.broadcast %6 : i32 to vector<1x768xi32>
    %8 = arith.cmpi slt, %2, %7 : vector<1x768xi32>
    %9 = arith.andi %5, %8 : vector<1x768xi1>
    %10 = vector.broadcast %1 : i32 to vector<1x768xi32>
    %11 = arith.cmpi sge, %3, %10 : vector<1x768xi32>
    %12 = arith.andi %9, %11 : vector<1x768xi1>
    %c6_i32_4 = arith.constant 6 : i32
    %13 = arith.addi %1, %c6_i32_4 : i32
    %14 = vector.broadcast %13 : i32 to vector<1x768xi32>
    %15 = arith.cmpi slt, %3, %14 : vector<1x768xi32>
    %16 = arith.andi %12, %15 : vector<1x768xi1>
    %c0_5 = arith.constant 0 : index
    %c0_6 = arith.constant 0 : index
    %17 = vector.load %arg3[%c0_5, %c0_6] : memref<1x768xf32, #tpu.memory_space<vmem>>, vector<1x768xf32>
    %18 = arith.negf %17 : vector<1x768xf32>
    %19 = math.exp %18 : vector<1x768xf32>
    %cst = arith.constant 1.000000e+00 : f32
    %20 = vector.broadcast %cst : f32 to vector<1x768xf32>
    %21 = arith.addf %20, %19 : vector<1x768xf32>
    %22 = arith.divf %20, %21 : vector<1x768xf32>
    %cst_7 = arith.constant 0.000000e+00 : f32
    %23 = vector.broadcast %cst_7 : f32 to vector<1x768xf32>
    %24 = arith.select %16, %22, %23 : vector<1x768xi1>, vector<1x768xf32>
    %c0_8 = arith.constant 0 : index
    %c0_9 = arith.constant 0 : index
    %25 = vector.load %arg5[%c0_8, %c0_9] : memref<4x768xf32, #tpu.memory_space<vmem>>, vector<4x768xf32>
    %26 = vector.broadcast %24 : vector<1x768xf32> to vector<4x768xf32>
    %27 = arith.addf %25, %26 : vector<4x768xf32>
    %cst_10 = arith.constant 0.000000e+00 : f32
    %cst_11 = arith.constant 1.000000e+00 : f32
    %28 = vector.broadcast %cst_10 : f32 to vector<4x768xf32>
    %29 = arith.maximumf %28, %27 : vector<4x768xf32>
    %30 = vector.broadcast %cst_11 : f32 to vector<4x768xf32>
    %31 = arith.minimumf %30, %29 : vector<4x768xf32>
    %c0_12 = arith.constant 0 : index
    %c0_13 = arith.constant 0 : index
    %32 = vector.load %arg4[%c0_12, %c0_13] : memref<2x768xf32, #tpu.memory_space<vmem>>, vector<1x768xf32>
    %33 = vector.broadcast %32 : vector<1x768xf32> to vector<4x768xf32>
    %34 = arith.mulf %31, %33 : vector<4x768xf32>
    %c1_14 = arith.constant 1 : index
    %c0_15 = arith.constant 0 : index
    %35 = vector.load %arg4[%c1_14, %c0_15] : memref<2x768xf32, #tpu.memory_space<vmem>>, vector<1x768xf32>
    %36 = vector.broadcast %35 : vector<1x768xf32> to vector<4x768xf32>
    %37 = arith.addf %34, %36 : vector<4x768xf32>
    %c0_16 = arith.constant 0 : index
    %c0_17 = arith.constant 0 : index
    %38 = vector.load %arg6[%c0_16, %c0_17] : memref<4x768xf32, #tpu.memory_space<vmem>>, vector<4x768xf32>
    tpu.vector_store %arg6[%c0_16, %c0_17], %37 {strides = array<i32>} : memref<4x768xf32, #tpu.memory_space<vmem>>, vector<4x768xf32>,
    return
  }
  func.func @transform_0(%arg0: i32, %arg1: memref<2xi32, #tpu.memory_space<smem>>) -> (i32, i32) {
    %c0_i32 = arith.constant 0 : i32
    %c0_i32_0 = arith.constant 0 : i32
    %c0_i32_1 = arith.constant 0 : i32
    return %c0_i32, %c0_i32_0 : i32, i32
  }
  func.func @transform_1(%arg0: i32, %arg1: memref<2xi32, #tpu.memory_space<smem>>) -> (i32, i32) {
    %c0_i32 = arith.constant 0 : i32
    %c0_i32_0 = arith.constant 0 : i32
    %c0_i32_1 = arith.constant 0 : i32
    return %c0_i32, %c0_i32_0 : i32, i32
  }
  func.func @transform_2(%arg0: i32, %arg1: memref<2xi32, #tpu.memory_space<smem>>) -> (i32, i32) {
    %c0_i32 = arith.constant 0 : i32
    %c0_i32_0 = arith.constant 0 : i32
    %c0_i32_1 = arith.constant 0 : i32
    return %c0_i32, %c0_i32_0 : i32, i32
  }
  func.func @transform_3(%arg0: i32, %arg1: memref<2xi32, #tpu.memory_space<smem>>) -> (i32, i32) {
    %c0_i32 = arith.constant 0 : i32
    %c0_i32_0 = arith.constant 0 : i32
    return %arg0, %c0_i32 : i32, i32
  }
  func.func @transform_4(%arg0: i32, %arg1: memref<2xi32, #tpu.memory_space<smem>>) -> (i32, i32) {
    %c0_i32 = arith.constant 0 : i32
    %c0_i32_0 = arith.constant 0 : i32
    return %arg0, %c0_i32 : i32, i32
  }
}

</mosaic_0001>

<bundles_post_ra>
// kernel: tpu_custom_call.1
= control target key start
LH: loop header
LB: loop body
LE: loop exit
PB: predicated region body
PF: predicated region fallthrough
CT: control target
= control target key end

     0   :  { %s360_s18 = smov [#allocation3]   ;;  %s414_s0 = inlined_call_operand.hbm [shape: s32[2], index: 0, kind: input, shape index: {}]   ;;  %s415_s1 = inlined_call_operand.hbm [shape: s32[2,768], index: 1, kind: input, shape index: {}]   ;;  %s416_s2 = inlined_call_operand.hbm [shape: f32[1,768], index: 2, kind: input, shape index: {}]   ;;  %s417_s3 = inlined_call_operand.hbm [shape: f32[2,768], index: 3, kind: input, shape index: {}]   ;;  %s418_s4 = inlined_call_operand.hbm [shape: f32[4,768], index: 4, kind: input, shape index: {}]   ;;  %s419_s5 = inlined_call_operand.hbm [shape: f32[4,768], index: 5, kind: output, shape index: {}]  }
   0x1   :  { %11 = dma.hbm_to_smem %s414_s0, 16, %s360_s18, [#allocation2] }
   0x2   :  { %350 = dma.done.wait [#allocation2], 16 }
   0x3   :  { %351 = vsyncadd [#allocation2], 4294967280 }
   0x4   :  { %13 = sfence }
   0x5   :  { %14 = vsyncpa [#allocation5], 0 }
   0x6   :  { %15 = vsyncpa [#allocation8], 0 }
   0x7   :  { %16 = vsyncpa [#allocation11], 0 }
   0x8   :  { %17 = vsyncpa [#allocation6], 0  ;;  %s361_s21 = smov [#allocation7]   ;;  %s362_s23 = smov [#allocation4]  }
   0x9   :  { %s34_s22 = sshll.u32 %s361_s21, 4  ;;  %s24_s24 = sshll.u32 %s362_s23, 4  ;;  %s35_s22 = int_to_ptr.vmem [resolvable:$true] %s34_s22  ;;  %s25_s24 = int_to_ptr.vmem [resolvable:$true] %s24_s24 }
   0xa   :  { %s258_s25 = scalar_lea.vmem %s35_s22, 96  ;;  %p263_p1 = scmp.lt.s32.totalorder %s35_s22, %s35_s22 }
   0xb   :  { %p259_p0 = scmp.ne.s32.totalorder %s35_s22, %s258_s25  ;;  %p264_p2 = scmp.lt.s32.totalorder %s258_s25, %s258_s25 }
   0xd   :  { %p265_p3 = por %p264_p2, %p263_p1 }
   0xf   :  { %p266_p4 = pnand %p265_p3, %p259_p0 }
  0x11   :  { %269 = shalt.err (!%p266_p4)
}
  0x12   :  { %37 = dma.hbm_to_vmem [thread:$0]  %s416_s2, 96, %s35_s22, [#allocation8]  }
  0x13   :  { %s278_s27 = scalar_lea.vmem %s25_s24, 192  ;;  %p283_p6 = scmp.lt.s32.totalorder %s25_s24, %s25_s24 }
  0x14   :  { %p279_p5 = scmp.ne.s32.totalorder %s25_s24, %s278_s27  ;;  %p284_p7 = scmp.lt.s32.totalorder %s278_s27, %s278_s27 }
  0x16   :  { %p285_p8 = por %p284_p7, %p283_p6 }
  0x18   :  { %p286_p9 = pnand %p285_p8, %p279_p5 }
  0x1a   :  { %289 = shalt.err (!%p286_p9)
}
  0x1b   :  { %27 = dma.hbm_to_vmem [thread:$0]  %s415_s1, 192, %s25_s24, [#allocation5]  }
  0x1c   :  { %s363_s30 = smov [#allocation9]   ;;  %s364_s7 = smov [#allocation10]  }
  0x1d   :  { %s44_s6 = sshll.u32 %s363_s30, 4  ;;  %s54_s8 = sshll.u32 %s364_s7, 4  ;;  %s45_s6 = int_to_ptr.vmem [resolvable:$true] %s44_s6  ;;  %s55_s8 = int_to_ptr.vmem [resolvable:$true] %s54_s8 }
  0x1e   :  { %s298_s9 = scalar_lea.vmem %s45_s6, 192  ;;  %p303_p11 = scmp.lt.s32.totalorder %s45_s6, %s45_s6 }
  0x1f   :  { %p299_p10 = scmp.ne.s32.totalorder %s45_s6, %s298_s9  ;;  %p304_p12 = scmp.lt.s32.totalorder %s298_s9, %s298_s9 }
  0x21   :  { %p305_p13 = por %p304_p12, %p303_p11 }
  0x23   :  { %p306_p0 = pnand %p305_p13, %p299_p10 }
  0x25   :  { %309 = shalt.err (!%p306_p0)
}
  0x26   :  { %47 = dma.hbm_to_vmem [thread:$0]  %s417_s3, 192, %s45_s6, [#allocation8]  }
  0x27   :  { %s318_s11 = scalar_lea.vmem %s55_s8, 384  ;;  %p323_p2 = scmp.lt.s32.totalorder %s55_s8, %s55_s8 }
  0x28   :  { %p319_p1 = scmp.ne.s32.totalorder %s55_s8, %s318_s11  ;;  %p324_p3 = scmp.lt.s32.totalorder %s318_s11, %s318_s11 }
  0x2a   :  { %p325_p4 = por %p324_p3, %p323_p2 }
  0x2c   :  { %p326_p5 = pnand %p325_p4, %p319_p1 }
  0x2e   :  { %329 = shalt.err (!%p326_p5)
}
  0x2f   :  { %57 = dma.hbm_to_vmem [thread:$0]  %s418_s4, 384, %s55_s8, [#allocation11]  }
  0x30   :  { %352 = dma.done.wait [#allocation5], 192  }
  0x31   :  { %353 = vsyncadd [#allocation5], 4294967104 }
  0x32   :  { %354 = dma.done.wait [#allocation8], 288  }
  0x33   :  { %355 = vsyncadd [#allocation8], 4294967008 }
  0x34   :  { %356 = dma.done.wait [#allocation11], 384  }
  0x35   :  { %357 = vsyncadd [#allocation11], 4294966912  ;;  %v88_v0 = vld [vmem:[#allocation7] sm:$0x3f]  ;;  %s70_s3 = sld [smem:[#allocation3]]  ;;  %v100_v9 = vlaneseq  ;;  %v96_v27 = vld [vmem:[#allocation10] sm:$0xff] }
  0x36   :  { %v231_v1 = vmul.f32 -1.442695, %v88_v0  ;;  %s230_s13 = sld [smem:[#allocation3 + $0x1]]  ;;  %v72_v4 = vld [vmem:[#allocation4] ss:$2 sm:$0x3f] }
  0x37   :  { %v74_v7 = vld [vmem:[#allocation4 + $0x1] ss:$2 sm:$0x3f]  ;;  %v101_v11 = vshrl.u32 %v100_v9, 7  ;;  %v98_v37 = vld [vmem:[#allocation10 + $0x10] sm:$0xff]  ;;  %s365_s15 = smov [#allocation12]  }
  0x38   :  { %238 = vpow2.f32 %v231_v1  ;;  %v139_v14 = vld [vmem:[#allocation9] ss:$2 sm:$0x3f]  ;;  %v175_v20 = vld [vmem:[#allocation9 + $0x1] ss:$2 sm:$0x3f] }
  0x39   :  { %v102_v12 = vsub.s32 0, %v101_v11  ;;  %v106_v13 = vsub.s32 1, %v101_v11  ;;  %v110_v15 = vsub.s32 2, %v101_v11  ;;  %v114_v16 = vsub.s32 3, %v101_v11  ;;  %v97_v30 = vld [vmem:[#allocation10 + $0x8] sm:$0xff]  ;;  %s219_s16 = sshll.u32 %s365_s15, 4  ;;  %s220_s16 = int_to_ptr.vmem [resolvable:$true] %s219_s16 }
  0x3a   :  { %v118_v17 = vsub.s32 4, %v101_v11  ;;  %v122_v18 = vsub.s32 5, %v101_v11  ;;  %s330_s17 = scalar_lea.vmem %s220_s16, 384  ;;  %p335_p7 = scmp.lt.s32.totalorder %s220_s16, %s220_s16 }
  0x3b   :  { %s77_s14 = sadd.s32 6, %s70_s3  ;;  %v75_v5 = vstv %s70_s3  ;;  %v144_v22 = vrot.slane %v139_v14, %v102_v12  ;;  %v148_v28 = vrot.slane %v139_v14, %v106_v13  ;;  %v180_v29 = vrot.slane %v175_v20, %v102_v12  ;;  %p331_p6 = scmp.ne.s32.totalorder %s220_s16, %s330_s17 }
  0x3c   :  { %v78_v6 = vstv %s77_s14  ;;  %vm76_vm0 = vcmp.ge.s32.totalorder %v72_v4, %v75_v5  ;;  %v81_v8 = vstv %s230_s13  ;;  %s84_s4 = sadd.s32 6, %s230_s13  ;;  %v152_v35 = vrot.slane %v139_v14, %v110_v15  ;;  %p336_p8 = scmp.lt.s32.totalorder %s330_s17, %s330_s17 }
  0x3d   :  { %vm79_vm1 = vcmp.lt.s32.totalorder %v72_v4, %v78_v6  ;;  %vm82_vm3 = vcmp.ge.s32.totalorder %v74_v7, %v81_v8  ;;  %v85_v10 = vstv %s84_s4  ;;  %v156_v36 = vrot.slane %v139_v14, %v114_v16 }
  0x3e   :  { %vm80_vm2 = vmand %vm76_vm0, %vm79_vm1  ;;  %vm86_vm5 = vcmp.lt.s32.totalorder %v74_v7, %v85_v10  ;;  %v184_v38 = vrot.slane %v175_v20, %v106_v13  ;;  %v160_v40 = vrot.slane %v139_v14, %v118_v17  ;;  %v164_v41 = vrot.slane %v139_v14, %v122_v18  ;;  %p337_p9 = por %p336_p8, %p335_p7 }
  0x3f   :  { %vm83_vm4 = vmand %vm80_vm2, %vm82_vm3  ;;  %v188_v44 = vrot.slane %v175_v20, %v110_v15  ;;  %v192_v45 = vrot.slane %v175_v20, %v114_v16  ;;  %v196_v47 = vrot.slane %v175_v20, %v118_v17  ;;  %v200_v48 = vrot.slane %v175_v20, %v122_v18 }
  0x40   :  { %vm87_vm6 = vmand %vm83_vm4, %vm86_vm5  ;;  %v165_v50 = vcombine.low %v144_v22, %v148_v28  ;;  %v166_v52 = vcombine.low %v152_v35, %v156_v36  ;;  %v167_v54 = vcombine.low %v160_v40, %v164_v41  ;;  %v201_v56 = vcombine.low %v180_v29, %v184_v38  ;;  %p338_p10 = pnand %p337_p9, %p331_p6 }
  0x41   :  { %v202_v58 = vcombine.low %v188_v44, %v192_v45  ;;  %v203_v60 = vcombine.low %v196_v47, %v200_v48 }
  0x45   :  { %v239_v2 = vpop.eup %238 }
  0x46   :  { %v92_v3 = vadd.f32 1.0, %v239_v2 }
  0x48   :  { %240 = vrcp.f32 %v92_v3 }
  0x55   :  { %v241_v19 = vpop.eup %240 }
  0x56   :  { %v95_v21 = vsel %vm87_vm6, %v241_v19, 0.0 }
  0x57   :  { %v103_v23 = vrot.slane %v95_v21, %v102_v12  ;;  %v107_v24 = vrot.slane %v95_v21, %v106_v13  ;;  %v111_v25 = vrot.slane %v95_v21, %v110_v15  ;;  %v115_v26 = vrot.slane %v95_v21, %v114_v16 }
  0x58   :  { %v119_v31 = vrot.slane %v95_v21, %v118_v17  ;;  %v123_v32 = vrot.slane %v95_v21, %v122_v18 }
  0x59   :  { %v124_v33 = vcombine.low %v103_v23, %v107_v24  ;;  %v125_v34 = vcombine.low %v111_v25, %v115_v26 }
  0x5a   :  { %v126_v39 = vcombine.low %v119_v31, %v123_v32 }
  0x5b   :  { %v130_v42 = vadd.f32 %v124_v33, %v96_v27  ;;  %v131_v43 = vadd.f32 %v125_v34, %v97_v30 }
  0x5c   :  { %v132_v46 = vadd.f32 %v126_v39, %v98_v37 }
  0x5d   :  { %v133_v49 = vmax.f32 %v130_v42, 0.0  ;;  %v134_v51 = vmax.f32 %v131_v43, 0.0 }
  0x5e   :  { %v135_v53 = vmax.f32 %v132_v46, 0.0 }
  0x5f   :  { %v136_v55 = vmin.f32 %v133_v49, 1.0  ;;  %v137_v57 = vmin.f32 %v134_v51, 1.0 }
  0x60   :  { %v138_v59 = vmin.f32 %v135_v53, 1.0 }
  0x61   :  { %v171_v61 = vmul.f32 %v165_v50, %v136_v55  ;;  %v172_v62 = vmul.f32 %v166_v52, %v137_v57 }
  0x62   :  { %v173_v63 = vmul.f32 %v167_v54, %v138_v59 }
  0x63   :  { %v207_v0 = vadd.f32 %v201_v56, %v171_v61  ;;  %v208_v1 = vadd.f32 %v202_v58, %v172_v62 }
  0x64   :  { %v209_v2 = vadd.f32 %v203_v60, %v173_v63 }
  0x65   :  { %210 = vst [vmem:[#allocation12] sm:$0xff] %v207_v0  ;;  %211 = vst [vmem:[#allocation12 + $0x8] sm:$0xff] %v208_v1 }
  0x66   :  { %212 = vst [vmem:[#allocation12 + $0x10] sm:$0xff] %v209_v2 }
  0x67   :  { %341 = shalt.err (!%p338_p10)
}
  0x68   :  { %222 = dma.vmem_to_hbm [thread:$0]  %s220_s16, 384, %s419_s5, [#allocation6]  }
  0x69   :  { %358 = dma.done.wait [#allocation6], 384  }
  0x6a   :  { %359 = vsyncadd [#allocation6], 4294966912 }
  0x6b   :  { %226 = vsyncpa [#allocation5], 1 }
  0x6c   :  { %227 = vsyncpa [#allocation8], 1 }
  0x6d   :  { %228 = vsyncpa [#allocation11], 1 }
  0x6e   :  { %229 = vsyncpa [#allocation6], 1 }

</bundles_post_ra>
